<compile_context>
chip_gen: v6e
topology: v6e:2x2x1
jax: 0.10.0
libtpu: 0.0.40
codegen_flags: <defaults>
</compile_context>

<pallas_src>
import functools

import jax
import jax.numpy as jnp
from jax.experimental import pallas as pl
from jax.experimental.pallas import tpu as pltpu


def _round_up(x: int, m: int) -> int:
    return (x + m - 1) // m * m


def _vmem_capacity_bytes() -> int:
    try:
        cap = getattr(pltpu.get_tpu_info(), "vmem_capacity_bytes", None)
        if cap:
            return int(cap)
    except Exception:
        pass
    return 64 << 20  # safe fallback for any generation (v7x has 64 MiB/TC)


def _projector_kernel(x_ref, w_ref, b_ref, o_ref, *, add_nonlinearity: bool):
    # x_ref: [tm, d_in], w_ref: [d_in, tn], b_ref: [1, tn] (f32), o_ref: [tm, tn]
    y = jnp.dot(x_ref[...], w_ref[...], preferred_element_type=jnp.float32)
    y = y + b_ref[...]                      # bias add in f32 (broadcast over rows)
    if add_nonlinearity:
        y = jnp.maximum(y, 0.0)             # fused ReLU (VPU, rides under MXU/DMA)
    o_ref[...] = y.astype(o_ref.dtype)


def feature_projector(features, weight_t, bias, *, add_nonlinearity=False,
                      operand_dtype=None):
    """features: [..., d_input]; weight_t: [d_input, d_output]; bias: [d_output].

    operand_dtype: optional dtype (e.g. jnp.bfloat16) for x/weight at the
    pallas_call boundary; accumulation and bias/ReLU stay in f32, output keeps
    features.dtype.
    """
    d_input, d_output = weight_t.shape
    lead_shape = features.shape[:-1]
    out_dtype = features.dtype

    op_dtype = jnp.dtype(operand_dtype) if operand_dtype is not None \
        else jnp.dtype(features.dtype)
    x2d = features.reshape(-1, d_input).astype(op_dtype)
    w = weight_t.astype(op_dtype)                  # no-op if pre-cast at init
    b2d = bias.reshape(1, d_output).astype(jnp.float32)

    m = x2d.shape[0]
    op_size = op_dtype.itemsize
    out_size = jnp.dtype(out_dtype).itemsize
    sublane = {4: 8, 2: 16, 1: 32}.get(op_size, 8)

    vmem_cap = _vmem_capacity_bytes()
    vmem_target = max(vmem_cap - (16 << 20), 32 << 20)   # headroom below capacity

    # --- N (d_output) tiling: keep whole weight resident unless it would eat
    # more than ~1/3 of usable VMEM (v7x 64 MiB case). ------------------------
    weight_budget = vmem_target // 3
    if d_input * d_output * op_size <= weight_budget or d_output <= 128:
        tn = d_output          # whole output dim per block (masked vst if <128)
    else:
        tn = max(128, (weight_budget // (d_input * op_size)) // 128 * 128)
        tn = min(tn, d_output)
    gn = pl.cdiv(d_output, tn)

    kernel = functools.partial(_projector_kernel,
                               add_nonlinearity=add_nonlinearity)

    def build(single_buffer: bool):
        w_bufs = 1 if single_buffer else 2
        weight_resident = d_input * tn * op_size * w_bufs

        # --- row tile: scale with feature dims / VMEM; sublane-rounded -------
        # per-row VMEM: double-buffered x & out tiles + f32 matmul intermediate
        per_row = 2 * d_input * op_size + 2 * tn * out_size + tn * 4
        tile_budget = max(vmem_target - weight_resident - (4 << 20),
                          per_row * sublane)
        tm = int(tile_budget // per_row)
        tm = min(tm, 8192, _round_up(m, sublane))
        tm = max(sublane, (tm // sublane) * sublane)
        gm = pl.cdiv(m, tm)

        vmem_needed = (weight_resident
                       + w_bufs * tn * 4                       # bias (f32)
                       + 2 * tm * d_input * op_size            # x tiles (dbl-buf)
                       + 2 * tm * tn * out_size                # out tiles (dbl-buf)
                       + tm * tn * 4)                          # f32 intermediate
        vmem_limit = int(min(max(vmem_needed + (4 << 20), 32 << 20),
                             vmem_cap - (8 << 20)))

        wb_kwargs = dict(pipeline_mode=pl.Buffered(1)) if single_buffer else {}
        in_specs = [
            pl.BlockSpec((tm, d_input), lambda j, i: (i, 0)),            # x rows
            pl.BlockSpec((d_input, tn), lambda j, i: (0, j), **wb_kwargs),  # W
            pl.BlockSpec((1, tn), lambda j, i: (0, j), **wb_kwargs),        # bias
        ]
        out_spec = pl.BlockSpec((tm, tn), lambda j, i: (i, j))

        cost = pl.CostEstimate(
            flops=2 * m * d_input * d_output,
            transcendentals=0,
            bytes_accessed=(m * d_input + d_input * d_output) * op_size
                           + m * d_output * out_size,
        )

        return pl.pallas_call(
            kernel,
            out_shape=jax.ShapeDtypeStruct((m, d_output), out_dtype),
            grid_spec=pltpu.PrefetchScalarGridSpec(
                num_scalar_prefetch=0,
                grid=(gn, gm),          # N outer -> weight resident across rows
                in_specs=in_specs,
                out_specs=out_spec,
            ),
            compiler_params=pltpu.CompilerParams(
                # rows "parallel" for megacore sharding (use CORE_PARALLEL on
                # v7x if profiling shows the row loop is not split across TCs)
                dimension_semantics=("arbitrary", "parallel"),
                vmem_limit_bytes=vmem_limit,
            ),
            cost_estimate=cost,
        )

    try:
        out2d = build(single_buffer=True)(x2d, w, b2d)
    except Exception:
        # pipeline_mode=pl.Buffered(1) unsupported -> default double buffering.
        out2d = build(single_buffer=False)(x2d, w, b2d)

    return out2d.reshape(*lead_shape, d_output)


def init_feature_projector_params(key, d_input, d_output, dtype=jnp.float32):
    """Xavier-uniform weight (PyTorch layout [d_out, d_in]), zero bias; returns
    (weight_t [d_in, d_out], bias [d_out]). Cast weight_t to bf16 here (once)
    when using operand_dtype=jnp.bfloat16 so the per-call cast is a no-op."""
    limit = (6.0 / (d_input + d_output)) ** 0.5
    w = jax.random.uniform(
        key, (d_output, d_input), dtype=dtype, minval=-limit, maxval=limit
    )
    b = jnp.zeros((d_output,), dtype=dtype)
    return w.T, b  # store transposed so x @ W^T becomes x @ weight_t


if __name__ == "__main__":
    key = jax.random.PRNGKey(0)
    k_x, k_w = jax.random.split(key)

    batch, seq, d_input, d_output = 2, 8, 32, 64
    add_nonlinearity = True  # exercise the ReLU path too

    features = jax.random.normal(k_x, (batch, seq, d_input), dtype=jnp.float32)
    weight_t, bias = init_feature_projector_params(k_w, d_input, d_output)

    # Reference: Linear -> ReLU -> Dropout(p=0)=identity, in plain JAX.
    ref = features @ weight_t + bias
    ref = jnp.maximum(ref, 0.0) if add_nonlinearity else ref

    # f32 operand path (exact).
    out = jax.block_until_ready(
        feature_projector(features, weight_t, bias,
                          add_nonlinearity=add_nonlinearity))
    assert out.shape == (batch, seq, d_output)
    assert jnp.allclose(out, ref, atol=1e-5, rtol=1e-5)

    # bf16 operand path (HBM/MXU optimized); weight cast hoisted out of the call.
    weight_bf16 = weight_t.astype(jnp.bfloat16)
    out_bf16 = jax.block_until_ready(
        feature_projector(features, weight_bf16, bias,
                          add_nonlinearity=add_nonlinearity,
                          operand_dtype=jnp.bfloat16))
    assert out_bf16.shape == (batch, seq, d_output)
    assert jnp.allclose(out_bf16, ref, atol=5e-2, rtol=5e-2)

    print("KERNEL_OK")
</pallas_src>

<mosaic_0001>
module attributes {stable_mosaic.version = 11 : i64} {
  func.func @_projector_kernel(%arg0: i32, %arg1: i32, %arg2: memref<16x32xf32, #tpu.memory_space<vmem>>, %arg3: memref<32x64xf32, #tpu.memory_space<vmem>>, %arg4: memref<1x64xf32, #tpu.memory_space<vmem>>, %arg5: memref<16x64xf32, #tpu.memory_space<vmem>>) attributes {dimension_semantics = [#tpu.dimension_semantics<arbitrary>, #tpu.dimension_semantics<parallel>], iteration_bounds = array<i64: 1, 1>, scalar_prefetch = 0 : i64, scratch_operands = 0 : i64, tpu.core_type = #tpu.core_type<tc>, window_params = [{transform_indices = @transform_0, window_bounds = array<i64: 16, 32>}, {pipeline_mode = #tpu.pipeline_mode<synchronous>, transform_indices = @transform_1, window_bounds = array<i64: 32, 64>}, {pipeline_mode = #tpu.pipeline_mode<synchronous>, transform_indices = @transform_2, window_bounds = array<i64: 1, 64>}, {transform_indices = @transform_3, window_bounds = array<i64: 16, 64>}]} {
    %c0 = arith.constant 0 : index
    %c0_0 = arith.constant 0 : index
    %0 = vector.load %arg2[%c0, %c0_0] : memref<16x32xf32, #tpu.memory_space<vmem>>, vector<16x32xf32>
    %c0_1 = arith.constant 0 : index
    %c0_2 = arith.constant 0 : index
    %1 = vector.load %arg3[%c0_1, %c0_2] : memref<32x64xf32, #tpu.memory_space<vmem>>, vector<32x64xf32>
    %cst = arith.constant dense<0.000000e+00> : vector<16x64xf32>
    %2 = tpu.matmul %0, %1, %cst {dimension_numbers = #tpu.dot_dimension_numbers<[1], [0], [0], [1], [0, 0, 1, 1], [], []>} : vector<16x32xf32>, vector<32x64xf32>, vector<16x64xf32> -> vector<16x64xf32>
    %c0_3 = arith.constant 0 : index
    %c0_4 = arith.constant 0 : index
    %3 = vector.load %arg4[%c0_3, %c0_4] : memref<1x64xf32, #tpu.memory_space<vmem>>, vector<1x64xf32>
    %4 = vector.broadcast %3 : vector<1x64xf32> to vector<16x64xf32>
    %5 = arith.addf %2, %4 : vector<16x64xf32>
    %cst_5 = arith.constant 0.000000e+00 : f32
    %6 = vector.broadcast %cst_5 : f32 to vector<16x64xf32>
    %7 = arith.maximumf %5, %6 : vector<16x64xf32>
    %c0_6 = arith.constant 0 : index
    %c0_7 = arith.constant 0 : index
    %8 = vector.load %arg5[%c0_6, %c0_7] : memref<16x64xf32, #tpu.memory_space<vmem>>, vector<16x64xf32>
    tpu.vector_store %arg5[%c0_6, %c0_7], %7 {strides = array<i32>} : memref<16x64xf32, #tpu.memory_space<vmem>>, vector<16x64xf32>,
    return
  }
  func.func @transform_0(%arg0: i32, %arg1: i32) -> (i32, i32) {
    %c0_i32 = arith.constant 0 : i32
    %c0_i32_0 = arith.constant 0 : i32
    return %arg1, %c0_i32 : i32, i32
  }
  func.func @transform_1(%arg0: i32, %arg1: i32) -> (i32, i32) {
    %c0_i32 = arith.constant 0 : i32
    %c0_i32_0 = arith.constant 0 : i32
    return %c0_i32, %arg0 : i32, i32
  }
  func.func @transform_2(%arg0: i32, %arg1: i32) -> (i32, i32) {
    %c0_i32 = arith.constant 0 : i32
    %c0_i32_0 = arith.constant 0 : i32
    return %c0_i32, %arg0 : i32, i32
  }
  func.func @transform_3(%arg0: i32, %arg1: i32) -> (i32, i32) {
    %c0_i32 = arith.constant 0 : i32
    return %arg1, %arg0 : i32, i32
  }
}

module attributes {stable_mosaic.version = 11 : i64} {
  func.func @_projector_kernel(%arg0: i32, %arg1: i32, %arg2: memref<16x32xf32, #tpu.memory_space<vmem>>, %arg3: memref<32x64xf32, #tpu.memory_space<vmem>>, %arg4: memref<1x64xf32, #tpu.memory_space<vmem>>, %arg5: memref<16x64xf32, #tpu.memory_space<vmem>>) attributes {dimension_semantics = [#tpu.dimension_semantics<arbitrary>, #tpu.dimension_semantics<parallel>], iteration_bounds = array<i64: 1, 1>, scalar_prefetch = 0 : i64, scratch_operands = 0 : i64, tpu.core_type = #tpu.core_type<tc>, window_params = [{transform_indices = @transform_0, window_bounds = array<i64: 16, 32>}, {transform_indices = @transform_1, window_bounds = array<i64: 32, 64>}, {transform_indices = @transform_2, window_bounds = array<i64: 1, 64>}, {transform_indices = @transform_3, window_bounds = array<i64: 16, 64>}]} {
    %c0 = arith.constant 0 : index
    %c0_0 = arith.constant 0 : index
    %0 = vector.load %arg2[%c0, %c0_0] : memref<16x32xf32, #tpu.memory_space<vmem>>, vector<16x32xf32>
    %c0_1 = arith.constant 0 : index
    %c0_2 = arith.constant 0 : index
    %1 = vector.load %arg3[%c0_1, %c0_2] : memref<32x64xf32, #tpu.memory_space<vmem>>, vector<32x64xf32>
    %cst = arith.constant dense<0.000000e+00> : vector<16x64xf32>
    %2 = tpu.matmul %0, %1, %cst {dimension_numbers = #tpu.dot_dimension_numbers<[1], [0], [0], [1], [0, 0, 1, 1], [], []>} : vector<16x32xf32>, vector<32x64xf32>, vector<16x64xf32> -> vector<16x64xf32>
    %c0_3 = arith.constant 0 : index
    %c0_4 = arith.constant 0 : index
    %3 = vector.load %arg4[%c0_3, %c0_4] : memref<1x64xf32, #tpu.memory_space<vmem>>, vector<1x64xf32>
    %4 = vector.broadcast %3 : vector<1x64xf32> to vector<16x64xf32>
    %5 = arith.addf %2, %4 : vector<16x64xf32>
    %cst_5 = arith.constant 0.000000e+00 : f32
    %6 = vector.broadcast %cst_5 : f32 to vector<16x64xf32>
    %7 = arith.maximumf %5, %6 : vector<16x64xf32>
    %c0_6 = arith.constant 0 : index
    %c0_7 = arith.constant 0 : index
    %8 = vector.load %arg5[%c0_6, %c0_7] : memref<16x64xf32, #tpu.memory_space<vmem>>, vector<16x64xf32>
    tpu.vector_store %arg5[%c0_6, %c0_7], %7 {strides = array<i32>} : memref<16x64xf32, #tpu.memory_space<vmem>>, vector<16x64xf32>,
    return
  }
  func.func @transform_0(%arg0: i32, %arg1: i32) -> (i32, i32) {
    %c0_i32 = arith.constant 0 : i32
    %c0_i32_0 = arith.constant 0 : i32
    return %arg1, %c0_i32 : i32, i32
  }
  func.func @transform_1(%arg0: i32, %arg1: i32) -> (i32, i32) {
    %c0_i32 = arith.constant 0 : i32
    %c0_i32_0 = arith.constant 0 : i32
    return %c0_i32, %arg0 : i32, i32
  }
  func.func @transform_2(%arg0: i32, %arg1: i32) -> (i32, i32) {
    %c0_i32 = arith.constant 0 : i32
    %c0_i32_0 = arith.constant 0 : i32
    return %c0_i32, %arg0 : i32, i32
  }
  func.func @transform_3(%arg0: i32, %arg1: i32) -> (i32, i32) {
    %c0_i32 = arith.constant 0 : i32
    return %arg1, %arg0 : i32, i32
  }
}

</mosaic_0001>

<bundles_post_ra>
// kernel: tpu_custom_call.1
= control target key start
LH: loop header
LB: loop body
LE: loop exit
PB: predicated region body
PF: predicated region fallthrough
CT: control target
= control target key end

     0   :  { %8 = vsyncpa [#allocation3], 0  ;;  %s300_s0 = inlined_call_operand.hbm [shape: f32[16,32], index: 0, kind: input, shape index: {}]   ;;  %s301_s1 = inlined_call_operand.hbm [shape: f32[32,64], index: 1, kind: input, shape index: {}]   ;;  %s302_s2 = inlined_call_operand.vmem [shape: f32[1,64], index: 2, kind: input, shape index: {}]   ;;  %s303_s3 = inlined_call_operand.hbm [shape: f32[16,64], index: 3, kind: output, shape index: {}]  }
   0x1   :  { %9 = vsyncpa [#allocation6], 0 }
   0x2   :  { %10 = vsyncpa [#allocation4], 0  ;;  %s252_s12 = smov [#allocation2]  }
   0x3   :  { %s16_s13 = sshll.u32 %s252_s12, 4  ;;  %s17_s13 = int_to_ptr.vmem [resolvable:$true] %s16_s13 }
   0x4   :  { %s194_s14 = scalar_lea.vmem %s17_s13, 256  ;;  %p199_p1 = scmp.lt.s32.totalorder %s17_s13, %s17_s13 }
   0x5   :  { %p195_p0 = scmp.ne.s32.totalorder %s17_s13, %s194_s14  ;;  %p200_p2 = scmp.lt.s32.totalorder %s194_s14, %s194_s14 }
   0x7   :  { %p201_p3 = por %p200_p2, %p199_p1 }
   0x9   :  { %p202_p4 = pnand %p201_p3, %p195_p0 }
   0xb   :  { %205 = shalt.err (!%p202_p4)
}
   0xc   :  { %s253_s15 = smov 128   ;;  %s254_s16 = smov 8  }
   0xd   :  { %22 = dma.hbm_to_vmem [thread:$0]  %s300_s0, 256, %s17_s13, [#allocation3], %s253_s15, %s253_s15, %s254_s16  }
   0xe   :  { %s255_s19 = smov [#allocation5]  }
   0xf   :  { %s28_s20 = sshll.u32 %s255_s19, 4  ;;  %s29_s20 = int_to_ptr.vmem [resolvable:$true] %s28_s20 }
  0x10   :  { %s214_s21 = scalar_lea.vmem %s29_s20, 512  ;;  %p219_p6 = scmp.lt.s32.totalorder %s29_s20, %s29_s20 }
  0x11   :  { %p215_p5 = scmp.ne.s32.totalorder %s29_s20, %s214_s21  ;;  %p220_p7 = scmp.lt.s32.totalorder %s214_s21, %s214_s21 }
  0x13   :  { %p221_p8 = por %p220_p7, %p219_p6 }
  0x15   :  { %p222_p9 = pnand %p221_p8, %p215_p5 }
  0x17   :  { %225 = shalt.err (!%p222_p9)
}
  0x18   :  { %34 = dma.hbm_to_vmem [thread:$0]  %s301_s1, 512, %s29_s20, [#allocation6], %s253_s15, %s253_s15, %s254_s16  }
  0x19   :  { %246 = dma.done.wait [#allocation3], 256  }
  0x1a   :  { %247 = vsyncadd [#allocation3], 4294967040 }
  0x1b   :  { %248 = dma.done.wait [#allocation6], 512  }
  0x1c   :  { %249 = vsyncadd [#allocation6], 4294966784  ;;  %vm56_vm0 = vcmask 261120   ;;  %v48_v0 = vld [vmem:[#allocation5 + $0x18] sm:$0xff]  ;;  %v47_v1 = vld [vmem:[#allocation5 + $0x10] sm:$0xff]  ;;  %vm140_vm1 = vcmask 523264  }
  0x1d   :  { %170 = vmatprep.subr.mxu0 %v48_v0  ;;  %v43_v2 = vld [vmem:[#allocation2] sm:$0xff]  ;;  %v46_v3 = vld [vmem:[#allocation5 + $0x8] sm:$0xff]  ;;  %v45_v4 = vld [vmem:[#allocation5] sm:$0xff]  ;;  %s256_s24 = smov [#allocation7]  }
  0x1e   :  { %171 = vmatpush3.msra.mxu0 %v48_v0  ;;  %178 = vmatprep.mubr.msk.f32.mxu0 %vm56_vm0, %v43_v2  ;;  %v44_v5 = vld [vmem:[#allocation2 + $0x8] sm:$0xff]  ;;  %v161_v6 = vld [vmem:[%s302_s2] ss:$0 sm:$0xff]  ;;  %s148_s25 = sshll.u32 %s256_s24, 4  ;;  %s149_s25 = int_to_ptr.vmem [resolvable:$true] %s148_s25 }
  0x1f   :  { %172 = vmatprep.subr.mxu0 %v47_v1  ;;  %s226_s26 = scalar_lea.vmem %s149_s25, 256  ;;  %p231_p11 = scmp.lt.s32.totalorder %s149_s25, %s149_s25 }
  0x20   :  { %173 = vmatpush3.msra.mxu0 %v47_v1  ;;  %p227_p10 = scmp.ne.s32.totalorder %s149_s25, %s226_s26  ;;  %p232_p12 = scmp.lt.s32.totalorder %s226_s26, %s226_s26 }
  0x21   :  { %174 = vmatprep.subr.mxu0 %v46_v3 }
  0x22   :  { %175 = vmatpush3.msra.mxu0 %v46_v3  ;;  %p233_p13 = por %p232_p12, %p231_p11 }
  0x23   :  { %176 = vmatprep.subr.mxu0 %v45_v4 }
  0x24   :  { %177 = vmatpush3.msra.mxu0 %v45_v4  ;;  %p234_p0 = pnand %p233_p13, %p227_p10 }
  0x25   :  { %179 = vmatmul.mubr.msk.f32.vlgmr.msra.gmra.mxu0 %vm56_vm0, %v44_v5 }
  0xe5   :  { %v180_v7 = vpop.f32.mrf.mxu0 }
  0xe6   :  { %v135_v8 = vadd.f32 %v180_v7, %v161_v6 }
  0xe7   :  { %v129_v9 = vpop.f32.mrf.mxu0 }
  0xe8   :  { %v139_v10 = vmax.f32 %v135_v8, 0.0  ;;  %v130_v11 = vadd.f32 %v161_v6, %v129_v9 }
  0xea   :  { %v138_v12 = vmax.f32 %v130_v11, 0.0  ;;  %142 = vst.msk [vmem:[#allocation7 + $0x8] sm:$0xff] %vm140_vm1, %v139_v10 }
  0xec   :  { %141 = vst.msk [vmem:[#allocation7] sm:$0xff] %vm140_vm1, %v138_v12 }
  0xed   :  { %237 = shalt.err (!%p234_p0)
}
  0xee   :  { %154 = dma.vmem_to_hbm [thread:$0]  %s149_s25, 256, %s303_s3, [#allocation4], %s253_s15, %s253_s15, %s254_s16  }
  0xef   :  { %250 = dma.done.wait [#allocation4], 256  }
  0xf0   :  { %251 = vsyncadd [#allocation4], 4294967040 }
  0xf1   :  { %158 = vsyncpa [#allocation3], 1 }
  0xf2   :  { %159 = vsyncpa [#allocation6], 1 }
  0xf3   :  { %160 = vsyncpa [#allocation4], 1 }

// kernel: tpu_custom_call.1
= control target key start
LH: loop header
LB: loop body
LE: loop exit
PB: predicated region body
PF: predicated region fallthrough
CT: control target
= control target key end

     0   :  { %8 = vsyncpa [#allocation3], 0  ;;  %s300_s0 = inlined_call_operand.hbm [shape: f32[16,32], index: 0, kind: input, shape index: {}]   ;;  %s301_s1 = inlined_call_operand.hbm [shape: f32[32,64], index: 1, kind: input, shape index: {}]   ;;  %s302_s2 = inlined_call_operand.vmem [shape: f32[1,64], index: 2, kind: input, shape index: {}]   ;;  %s303_s3 = inlined_call_operand.hbm [shape: f32[16,64], index: 3, kind: output, shape index: {}]  }
   0x1   :  { %9 = vsyncpa [#allocation6], 0 }
   0x2   :  { %10 = vsyncpa [#allocation4], 0  ;;  %s252_s12 = smov [#allocation2]  }
   0x3   :  { %s16_s13 = sshll.u32 %s252_s12, 4  ;;  %s17_s13 = int_to_ptr.vmem [resolvable:$true] %s16_s13 }
   0x4   :  { %s194_s14 = scalar_lea.vmem %s17_s13, 256  ;;  %p199_p1 = scmp.lt.s32.totalorder %s17_s13, %s17_s13 }
   0x5   :  { %p195_p0 = scmp.ne.s32.totalorder %s17_s13, %s194_s14  ;;  %p200_p2 = scmp.lt.s32.totalorder %s194_s14, %s194_s14 }
   0x7   :  { %p201_p3 = por %p200_p2, %p199_p1 }
   0x9   :  { %p202_p4 = pnand %p201_p3, %p195_p0 }
   0xb   :  { %205 = shalt.err (!%p202_p4)
}
   0xc   :  { %s253_s15 = smov 128   ;;  %s254_s16 = smov 8  }
   0xd   :  { %22 = dma.hbm_to_vmem [thread:$0]  %s300_s0, 256, %s17_s13, [#allocation3], %s253_s15, %s253_s15, %s254_s16  }
   0xe   :  { %s255_s19 = smov [#allocation5]  }
   0xf   :  { %s28_s20 = sshll.u32 %s255_s19, 4  ;;  %s29_s20 = int_to_ptr.vmem [resolvable:$true] %s28_s20 }
  0x10   :  { %s214_s21 = scalar_lea.vmem %s29_s20, 512  ;;  %p219_p6 = scmp.lt.s32.totalorder %s29_s20, %s29_s20 }
  0x11   :  { %p215_p5 = scmp.ne.s32.totalorder %s29_s20, %s214_s21  ;;  %p220_p7 = scmp.lt.s32.totalorder %s214_s21, %s214_s21 }
  0x13   :  { %p221_p8 = por %p220_p7, %p219_p6 }
  0x15   :  { %p222_p9 = pnand %p221_p8, %p215_p5 }
  0x17   :  { %225 = shalt.err (!%p222_p9)
}
  0x18   :  { %34 = dma.hbm_to_vmem [thread:$0]  %s301_s1, 512, %s29_s20, [#allocation6], %s253_s15, %s253_s15, %s254_s16  }
  0x19   :  { %246 = dma.done.wait [#allocation3], 256  }
  0x1a   :  { %247 = vsyncadd [#allocation3], 4294967040 }
  0x1b   :  { %248 = dma.done.wait [#allocation6], 512  }
  0x1c   :  { %249 = vsyncadd [#allocation6], 4294966784  ;;  %vm56_vm0 = vcmask 261120   ;;  %v48_v0 = vld [vmem:[#allocation5 + $0x18] sm:$0xff]  ;;  %v47_v1 = vld [vmem:[#allocation5 + $0x10] sm:$0xff]  ;;  %vm140_vm1 = vcmask 523264  }
  0x1d   :  { %170 = vmatprep.subr.mxu0 %v48_v0  ;;  %v43_v2 = vld [vmem:[#allocation2] sm:$0xff]  ;;  %v46_v3 = vld [vmem:[#allocation5 + $0x8] sm:$0xff]  ;;  %v45_v4 = vld [vmem:[#allocation5] sm:$0xff]  ;;  %s256_s24 = smov [#allocation7]  }
  0x1e   :  { %171 = vmatpush3.msra.mxu0 %v48_v0  ;;  %178 = vmatprep.mubr.msk.f32.mxu0 %vm56_vm0, %v43_v2  ;;  %v44_v5 = vld [vmem:[#allocation2 + $0x8] sm:$0xff]  ;;  %v161_v6 = vld [vmem:[%s302_s2] ss:$0 sm:$0xff]  ;;  %s148_s25 = sshll.u32 %s256_s24, 4  ;;  %s149_s25 = int_to_ptr.vmem [resolvable:$true] %s148_s25 }
  0x1f   :  { %172 = vmatprep.subr.mxu0 %v47_v1  ;;  %s226_s26 = scalar_lea.vmem %s149_s25, 256  ;;  %p231_p11 = scmp.lt.s32.totalorder %s149_s25, %s149_s25 }
  0x20   :  { %173 = vmatpush3.msra.mxu0 %v47_v1  ;;  %p227_p10 = scmp.ne.s32.totalorder %s149_s25, %s226_s26  ;;  %p232_p12 = scmp.lt.s32.totalorder %s226_s26, %s226_s26 }
  0x21   :  { %174 = vmatprep.subr.mxu0 %v46_v3 }
  0x22   :  { %175 = vmatpush3.msra.mxu0 %v46_v3  ;;  %p233_p13 = por %p232_p12, %p231_p11 }
  0x23   :  { %176 = vmatprep.subr.mxu0 %v45_v4 }
  0x24   :  { %177 = vmatpush3.msra.mxu0 %v45_v4  ;;  %p234_p0 = pnand %p233_p13, %p227_p10 }
  0x25   :  { %179 = vmatmul.mubr.msk.f32.vlgmr.msra.gmra.mxu0 %vm56_vm0, %v44_v5 }
  0xe5   :  { %v180_v7 = vpop.f32.mrf.mxu0 }
  0xe6   :  { %v135_v8 = vadd.f32 %v180_v7, %v161_v6 }
  0xe7   :  { %v129_v9 = vpop.f32.mrf.mxu0 }
  0xe8   :  { %v139_v10 = vmax.f32 %v135_v8, 0.0  ;;  %v130_v11 = vadd.f32 %v161_v6, %v129_v9 }
  0xea   :  { %v138_v12 = vmax.f32 %v130_v11, 0.0  ;;  %142 = vst.msk [vmem:[#allocation7 + $0x8] sm:$0xff] %vm140_vm1, %v139_v10 }
  0xec   :  { %141 = vst.msk [vmem:[#allocation7] sm:$0xff] %vm140_vm1, %v138_v12 }
  0xed   :  { %237 = shalt.err (!%p234_p0)
}
  0xee   :  { %154 = dma.vmem_to_hbm [thread:$0]  %s149_s25, 256, %s303_s3, [#allocation4], %s253_s15, %s253_s15, %s254_s16  }
  0xef   :  { %250 = dma.done.wait [#allocation4], 256  }
  0xf0   :  { %251 = vsyncadd [#allocation4], 4294967040 }
  0xf1   :  { %158 = vsyncpa [#allocation3], 1 }
  0xf2   :  { %159 = vsyncpa [#allocation6], 1 }
  0xf3   :  { %160 = vsyncpa [#allocation4], 1 }

</bundles_post_ra>
